<compile_context>
chip_gen: v5e
topology: v5e:2x2
jax: 0.10.0
libtpu: 0.0.40
codegen_flags: <defaults>
</compile_context>

<pallas_src>
import jax
import jax.numpy as jnp
from jax.experimental import pallas as pl
from jax.experimental.pallas import tpu as pltpu


# Tile constants for the hot GEMM.  Sized for the small demo below; for
# production meshes scale them per chip generation:
#   v5e : TILE_K ~ 512,  TILE_N ~ 512        (lower FLOP/byte balance, 1 vst slot)
#   v6e : TILE_K ~ 1024-2048, TILE_N ~ 512+  (raise vmem_limit toward ~96 MiB)
#   v7x : keep total resident VMEM (double buffers + scratch) <= ~48 MiB (64 MiB chip)
TILE_K = 128
TILE_N = 256
VMEM_LIMIT_BYTES = 48 * 1024 * 1024   # explicit cap; safe on v5e/v6e/v7x


def _round_up(x: int, m: int) -> int:
    return ((x + m - 1) // m) * m


def _decoder_kernel(x_ref, w_ref, g_ref, b_ref, o_ref, acc_ref):
    """One grid step: fused unflatten (K tile) + quadrature-conv GEMM tile.

    Grid = (n, k): n indexes output-column tiles (parallel), k indexes the
    Cin*Nin reduction (arbitrary, last).  acc_ref is a VMEM f32 accumulator.
    """
    k = pl.program_id(1)

    @pl.when(k == 0)
    def _init():
        acc_ref[...] = jnp.zeros_like(acc_ref)

    # Fused "unflatten" linear for this K tile: (Bp, Lp) @ (Lp, TILE_K), MXU,
    # f32 accumulate, then cast to bf16 for the big GEMM.
    f_k = jnp.dot(x_ref[...], w_ref[...],
                  preferred_element_type=jnp.float32).astype(jnp.bfloat16)

    # Quadrature-conv GEMM tile: (Bp, TILE_K) @ (TILE_K, TILE_N), f32 accumulate.
    acc_ref[...] += jnp.dot(f_k, g_ref[...], preferred_element_type=jnp.float32)

    @pl.when(k == pl.num_programs(1) - 1)
    def _finalize():
        # Fused bias (unflatten bias folded through the conv + conv bias),
        # output activation (tanh -> EUP), single cast + lane-dense store.
        y = acc_ref[...] + b_ref[...]            # (Bp, TILE_N) + (1, TILE_N)
        o_ref[...] = jnp.tanh(y).astype(o_ref.dtype)


def quadconv_decoder_forward(X, WliftT, G2T, bias_total, *, Cout, Nout,
                             tile_k=TILE_K, tile_n=TILE_N):
    """tanh((X @ WliftT) @ G2T + bias_total), returned channels-first (B, Cout, Nout).

    X          : (B, L)      latent codes (f32)
    WliftT     : (L, K)      unflatten weight, K = Cin*Nin
    G2T        : (K, N)      rho-folded quadrature kernel, N = Cout*Nout
    bias_total : (1, N)      G2 @ b_lift + repeat(b_conv, Nout)
    """
    B, L = X.shape
    K, N = G2T.shape
    assert WliftT.shape == (L, K)
    assert bias_total.shape == (1, N)
    assert N == Cout * Nout

    # ---- setup-time padding to MXU / lane-friendly sizes (not hot path) ------
    Bp = max(_round_up(B, 8), 8)                 # MXU M dim: at least 8 rows
    Lp = _round_up(L, 128)
    tile_k = min(tile_k, _round_up(K, 128))
    tile_n = min(tile_n, _round_up(N, 128))
    Kp = _round_up(K, tile_k)
    Np = _round_up(N, tile_n)

    # bf16 operands (halves HBM/VMEM traffic on G, ~2x MXU), zero-padded so the
    # ragged tails contribute nothing.  Bias / accumulator stay f32.
    Xp = jnp.zeros((Bp, Lp), jnp.bfloat16).at[:B, :L].set(X.astype(jnp.bfloat16))
    Wp = jnp.zeros((Lp, Kp), jnp.bfloat16).at[:L, :K].set(WliftT.astype(jnp.bfloat16))
    Gp = jnp.zeros((Kp, Np), jnp.bfloat16).at[:K, :N].set(G2T.astype(jnp.bfloat16))
    bp = jnp.zeros((1, Np), jnp.float32).at[:, :N].set(bias_total.astype(jnp.float32))

    grid = (Np // tile_n, Kp // tile_k)          # (output tiles, K reduction last)

    # TODO(synk): if G is banded / compactly supported at production scale, switch to
    # num_scalar_prefetch=1 with per-output-tile nonzero-K offsets to skip empty K blocks.
    y_flat = pl.pallas_call(
        _decoder_kernel,
        out_shape=jax.ShapeDtypeStruct((Bp, Np), jnp.float32),
        grid_spec=pltpu.PrefetchScalarGridSpec(
            num_scalar_prefetch=0,
            grid=grid,
            in_specs=[
                pl.BlockSpec((Bp, Lp), lambda n, k: (0, 0)),          # latent X (resident)
                pl.BlockSpec((Lp, tile_k), lambda n, k: (0, k)),      # unflatten weight, K tile
                pl.BlockSpec((tile_k, tile_n), lambda n, k: (k, n)),  # G' (rho folded), (K,N) tile
                pl.BlockSpec((1, tile_n), lambda n, k: (0, n)),       # fused bias row
            ],
            out_specs=pl.BlockSpec((Bp, tile_n), lambda n, k: (0, n)),
            scratch_shapes=[pltpu.VMEM((Bp, tile_n), jnp.float32)],   # f32 accumulator
        ),
        compiler_params=pltpu.CompilerParams(
            dimension_semantics=("parallel", "arbitrary"),
            vmem_limit_bytes=VMEM_LIMIT_BYTES,
        ),
    )(Xp, Wp, Gp, bp)

    # Strip padding, reshape to channels-first NCL as PyTorch returns it.
    return y_flat[:B, :N].reshape(B, Cout, Nout)


def _unit_grid(n_side):
    """(n_side**2, 2) points on a regular grid in the unit square."""
    xs = (jnp.arange(n_side, dtype=jnp.float32) + 0.5) / n_side
    gx, gy = jnp.meshgrid(xs, xs, indexing="ij")
    return jnp.stack([gx.ravel(), gy.ravel()], axis=-1)


if __name__ == "__main__":
    key = jax.random.PRNGKey(0)
    keys = jax.random.split(key, 8)

    # Small shapes consistent with the module.
    B, L = 2, 32            # batch, latent dim
    Cin, Nin = 4, 64        # coarse (decoder-input) mesh: channels, points (8x8 grid)
    Cout, Nout = 2, 256     # fine mirrored output mesh: channels, points (16x16 grid)
    dim = 2                 # spatial dimension of mesh points

    X = jax.random.normal(keys[0], (B, L), jnp.float32)

    # ---- mesh setup (plain JAX; this is `mesh.reset(mirror=True)`) ----------
    p_in = _unit_grid(8)                       # (Nin, 2) coarse quadrature points
    rho = jnp.full((Nin,), 1.0 / Nin, jnp.float32)   # quadrature weights
    p_out = _unit_grid(16)[::-1]               # (Nout, 2) mirrored (reversed-stage) fine points

    # ---- geometric kernel G_{co,ci}(p_out - p_in): small MLP + compact support
    H = 16
    W1 = 0.5 * jax.random.normal(keys[1], (dim, H), jnp.float32)
    b1 = 0.1 * jax.random.normal(keys[2], (H,), jnp.float32)
    W2 = 0.5 * jax.random.normal(keys[3], (H, Cout * Cin), jnp.float32)
    b2 = 0.1 * jax.random.normal(keys[4], (Cout * Cin,), jnp.float32)

    z = p_out[:, None, :] - p_in[None, :, :]                    # (Nout, Nin, 2)
    h = jnp.tanh(z @ W1 + b1)
    g = h @ W2 + b2                                             # (Nout, Nin, Cout*Cin)
    r2 = jnp.sum(z * z, axis=-1)
    support = jnp.exp(-16.0 * r2) * (r2 < 0.25).astype(jnp.float32)
    G = (g * support[..., None]).reshape(Nout, Nin, Cout, Cin)
    G = jnp.transpose(G, (2, 3, 0, 1))                          # (Cout, Cin, Nout, Nin)

    # Fold quadrature weights rho into G, flatten to a single GEMM operand.
    Gp = G * rho[None, None, None, :]
    G2 = jnp.transpose(Gp, (0, 2, 1, 3)).reshape(Cout * Nout, Cin * Nin)   # (N, K)
    G2T = G2.T                                                             # (K, N)

    # ---- unflatten linear + biases -------------------------------------------
    WliftT = 0.2 * jax.random.normal(keys[5], (L, Cin * Nin), jnp.float32)
    b_lift = 0.1 * jax.random.normal(keys[6], (Cin * Nin,), jnp.float32)
    b_conv = 0.1 * jax.random.normal(keys[7], (Cout,), jnp.float32)

    # Fold the unflatten bias through the (linear) conv; expand conv bias per point.
    bias_total = (G2 @ b_lift + jnp.repeat(b_conv, Nout)).reshape(1, Cout * Nout)

    # ---- run the Pallas kernel ------------------------------------------------
    y = quadconv_decoder_forward(X, WliftT, G2T, bias_total, Cout=Cout, Nout=Nout)
    y = jax.block_until_ready(y)

    # ---- pure-JAX reference (same bf16 operand casts, f32 accumulation) -------
    Xb, Wb, Gb = (X.astype(jnp.bfloat16), WliftT.astype(jnp.bfloat16),
                  G2T.astype(jnp.bfloat16))
    f_ref = jnp.dot(Xb, Wb, preferred_element_type=jnp.float32).astype(jnp.bfloat16)
    y_ref = jnp.tanh(jnp.dot(f_ref, Gb, preferred_element_type=jnp.float32) + bias_total)
    y_ref = y_ref.reshape(B, Cout, Nout)

    assert y.shape == (B, Cout, Nout)
    assert bool(jnp.allclose(y, y_ref, rtol=2e-2, atol=2e-2)), "kernel/reference mismatch"
    print("KERNEL_OK")
</pallas_src>

<mosaic_0001>
module attributes {stable_mosaic.version = 11 : i64} {
  func.func @_decoder_kernel(%arg0: i32, %arg1: i32, %arg2: memref<8x128xbf16, #tpu.memory_space<vmem>>, %arg3: memref<128x128xbf16, #tpu.memory_space<vmem>>, %arg4: memref<128x256xbf16, #tpu.memory_space<vmem>>, %arg5: memref<1x256xf32, #tpu.memory_space<vmem>>, %arg6: memref<8x256xf32, #tpu.memory_space<vmem>>, %arg7: memref<8x256xf32, #tpu.memory_space<vmem>>) attributes {dimension_semantics = [#tpu.dimension_semantics<parallel>, #tpu.dimension_semantics<arbitrary>], iteration_bounds = array<i64: 2, 2>, scalar_prefetch = 0 : i64, scratch_operands = 1 : i64, tpu.core_type = #tpu.core_type<tc>, window_params = [{pipeline_mode = #tpu.pipeline_mode<synchronous>, transform_indices = @transform_0, window_bounds = array<i64: 8, 128>}, {transform_indices = @transform_1, window_bounds = array<i64: 128, 128>}, {transform_indices = @transform_2, window_bounds = array<i64: 128, 256>}, {transform_indices = @transform_3, window_bounds = array<i64: 1, 256>}, {transform_indices = @transform_4, window_bounds = array<i64: 8, 256>}]} {
    %c0_i32 = arith.constant 0 : i32
    %0 = arith.cmpi eq, %arg1, %c0_i32 : i32
    %1 = arith.extui %0 : i1 to i32
    %c0_i32_0 = arith.constant 0 : i32
    %2 = arith.cmpi ne, %1, %c0_i32_0 : i32
    scf.if %2 {
      %cst_12 = arith.constant 0.000000e+00 : f32
      %15 = vector.broadcast %cst_12 : f32 to vector<8x256xf32>
      %c0_13 = arith.constant 0 : index
      %c0_14 = arith.constant 0 : index
      %16 = vector.load %arg7[%c0_13, %c0_14] : memref<8x256xf32, #tpu.memory_space<vmem>>, vector<8x256xf32>
      tpu.vector_store %arg7[%c0_13, %c0_14], %15 {strides = array<i32>} : memref<8x256xf32, #tpu.memory_space<vmem>>, vector<8x256xf32>,
    } else {
    }
    %c0 = arith.constant 0 : index
    %c0_1 = arith.constant 0 : index
    %3 = vector.load %arg2[%c0, %c0_1] : memref<8x128xbf16, #tpu.memory_space<vmem>>, vector<8x128xbf16>
    %c0_2 = arith.constant 0 : index
    %c0_3 = arith.constant 0 : index
    %4 = vector.load %arg3[%c0_2, %c0_3] : memref<128x128xbf16, #tpu.memory_space<vmem>>, vector<128x128xbf16>
    %cst = arith.constant dense<0.000000e+00> : vector<8x128xf32>
    %5 = tpu.matmul %3, %4, %cst {dimension_numbers = #tpu.dot_dimension_numbers<[1], [0], [0], [1], [0, 0, 1, 1], [], []>} : vector<8x128xbf16>, vector<128x128xbf16>, vector<8x128xf32> -> vector<8x128xf32>
    %6 = arith.truncf %5 : vector<8x128xf32> to vector<8x128xbf16>
    %c0_4 = arith.constant 0 : index
    %c0_5 = arith.constant 0 : index
    %7 = vector.load %arg7[%c0_4, %c0_5] : memref<8x256xf32, #tpu.memory_space<vmem>>, vector<8x256xf32>
    %c0_6 = arith.constant 0 : index
    %c0_7 = arith.constant 0 : index
    %8 = vector.load %arg4[%c0_6, %c0_7] : memref<128x256xbf16, #tpu.memory_space<vmem>>, vector<128x256xbf16>
    %cst_8 = arith.constant dense<0.000000e+00> : vector<8x256xf32>
    %9 = tpu.matmul %6, %8, %cst_8 {dimension_numbers = #tpu.dot_dimension_numbers<[1], [0], [0], [1], [0, 0, 1, 1], [], []>} : vector<8x128xbf16>, vector<128x256xbf16>, vector<8x256xf32> -> vector<8x256xf32>
    %10 = arith.addf %7, %9 : vector<8x256xf32>
    %c0_9 = arith.constant 0 : index
    %c0_10 = arith.constant 0 : index
    %11 = vector.load %arg7[%c0_9, %c0_10] : memref<8x256xf32, #tpu.memory_space<vmem>>, vector<8x256xf32>
    tpu.vector_store %arg7[%c0_9, %c0_10], %10 {strides = array<i32>} : memref<8x256xf32, #tpu.memory_space<vmem>>, vector<8x256xf32>,
    %c1_i32 = arith.constant 1 : i32
    %12 = arith.cmpi eq, %arg1, %c1_i32 : i32
    %13 = arith.extui %12 : i1 to i32
    %c0_i32_11 = arith.constant 0 : i32
    %14 = arith.cmpi ne, %13, %c0_i32_11 : i32
    scf.if %14 {
      %c0_12 = arith.constant 0 : index
      %c0_13 = arith.constant 0 : index
      %15 = vector.load %arg7[%c0_12, %c0_13] : memref<8x256xf32, #tpu.memory_space<vmem>>, vector<8x256xf32>
      %c0_14 = arith.constant 0 : index
      %c0_15 = arith.constant 0 : index
      %16 = vector.load %arg5[%c0_14, %c0_15] : memref<1x256xf32, #tpu.memory_space<vmem>>, vector<1x256xf32>
      %17 = vector.broadcast %16 : vector<1x256xf32> to vector<8x256xf32>
      %18 = arith.addf %15, %17 : vector<8x256xf32>
      %19 = math.tanh %18 : vector<8x256xf32>
      %c0_16 = arith.constant 0 : index
      %c0_17 = arith.constant 0 : index
      %20 = vector.load %arg6[%c0_16, %c0_17] : memref<8x256xf32, #tpu.memory_space<vmem>>, vector<8x256xf32>
      tpu.vector_store %arg6[%c0_16, %c0_17], %19 {strides = array<i32>} : memref<8x256xf32, #tpu.memory_space<vmem>>, vector<8x256xf32>,
    } else {
    }
    return
  }
  func.func @transform_0(%arg0: i32, %arg1: i32) -> (i32, i32) {
    %c0_i32 = arith.constant 0 : i32
    %c0_i32_0 = arith.constant 0 : i32
    %c0_i32_1 = arith.constant 0 : i32
    return %c0_i32, %c0_i32_0 : i32, i32
  }
  func.func @transform_1(%arg0: i32, %arg1: i32) -> (i32, i32) {
    %c0_i32 = arith.constant 0 : i32
    %c0_i32_0 = arith.constant 0 : i32
    return %c0_i32, %arg1 : i32, i32
  }
  func.func @transform_2(%arg0: i32, %arg1: i32) -> (i32, i32) {
    %c0_i32 = arith.constant 0 : i32
    return %arg1, %arg0 : i32, i32
  }
  func.func @transform_3(%arg0: i32, %arg1: i32) -> (i32, i32) {
    %c0_i32 = arith.constant 0 : i32
    %c0_i32_0 = arith.constant 0 : i32
    return %c0_i32, %arg0 : i32, i32
  }
  func.func @transform_4(%arg0: i32, %arg1: i32) -> (i32, i32) {
    %c0_i32 = arith.constant 0 : i32
    %c0_i32_0 = arith.constant 0 : i32
    return %c0_i32, %arg0 : i32, i32
  }
}

</mosaic_0001>

<bundles_post_ra>
// kernel: tpu_custom_call.1
= control target key start
LH: loop header
LB: loop body
LE: loop exit
PB: predicated region body
PF: predicated region fallthrough
CT: control target
= control target key end

     0   :  { %s1704_s0 = inlined_call_operand.hbm [shape: bf16[8,128], index: 0, kind: input, shape index: {}]   ;;  %s1705_s1 = inlined_call_operand.hbm [shape: bf16[128,256], index: 1, kind: input, shape index: {}]   ;;  %s1706_s2 = inlined_call_operand.hbm [shape: bf16[256,512], index: 2, kind: input, shape index: {}]   ;;  %s1707_s3 = inlined_call_operand.hbm [shape: f32[1,512], index: 3, kind: input, shape index: {}]   ;;  %s1708_s4 = inlined_call_operand.hbm [shape: f32[8,512], index: 4, kind: output, shape index: {}]  }
   0x1   :  { %1716 = sst [smem:[#allocation22_spill]] %s1704_s0 }
   0x2   :  { %1717 = sst [smem:[#allocation23_spill]] %s1705_s1 }
   0x3   :  { %1718 = sst [smem:[#allocation24_spill]] %s1706_s2 }
   0x4   :  { %1719 = sst [smem:[#allocation25_spill]] %s1707_s3 }
   0x5   :  { %1720 = sst [smem:[#allocation26_spill]] %s1708_s4 }
   0x6   :  { %9 = vsyncpa [#allocation4], 0 }
   0x7   :  { %10 = vsyncpa [#allocation7], 0 }
   0x8   :  { %12 = vsyncpa [#allocation7 + $0x1], 0 }
   0x9   :  { %13 = vsyncpa [#allocation10], 0 }
   0xa   :  { %15 = vsyncpa [#allocation10 + $0x1], 0 }
   0xb   :  { %16 = vsyncpa [#allocation5], 0 }
   0xc   :  { %18 = vsyncpa [#allocation5 + $0x1], 0  ;;  %s1336_s15 = smov 0   ;;  %s1338_s16 = smov 0  }
   0xd   :  { %s1340_s17 = smov 0   ;;  %s1342_s18 = smov 0  }
   0xe   :  { %s1344_s19 = smov 0   ;;  %s1346_s20 = smov 0  }
   0xf   :  { %s1348_s21 = smov 0   ;;  %s1350_s22 = smov 0  }
  0x10   :  { %s1352_s23 = smov 0   ;;  %s1354_s24 = smov 0  }
  0x11   :  { %s1356_s25 = smov 0   ;;  %s1358_s26 = smov 0  }
  0x12   :  { %s1360_s27 = smov 0   ;;  %s1362_s28 = smov 0  }
  0x13 LB: > { %1721 = sst [smem:[#allocation17_spill]] %s1286_s24  ;;  %s33_s29 = sadd.s32 1, %s1294_s26  ;;  %s1302_s28 = sphi %s1362_s28, %s24_s28   ;;  %s1298_s27 = sphi %s1360_s27, %s1762_s27   ;;  %s1294_s26 = sphi %s1358_s26, %s1750_s26   ;;  %s1290_s25 = sphi %s1356_s25, %s1761_s25   ;;  %s1286_s24 = sphi %s1354_s24, %s1749_s24   ;;  %s1282_s23 = sphi %s1352_s23, %s1760_s23   ;;  %s1278_s22 = sphi %s1350_s22, %s1759_s22   ;;  %s1274_s21 = sphi %s1348_s21, %s1758_s21   ;;  %s1270_s20 = sphi %s1346_s20, %s1757_s20   ;;  %s1266_s19 = sphi %s1344_s19, %s1756_s19   ;;  %s1262_s18 = sphi %s1342_s18, %s1755_s18   ;;  %s1258_s17 = sphi %s1340_s17, %s1754_s17   ;;  %s1254_s16 = sphi %s1338_s16, %s1753_s16   ;;  %s1250_s15 = sphi %s1336_s15, %s1752_s15  }
  0x14   : > { %1722 = sst [smem:[#allocation18_spill]] %s1290_s25  ;;  %p1408_p0 = scmp.ge.s32.totalorder %s33_s29, 2 }
  0x15   : > { %1723 = sst [smem:[#allocation19_spill]] %s1294_s26  ;;  %p71_p1 = scmp.ne.s32.totalorder %s1282_s23, %s1278_s22 }
  0x16   : > { %p72_p2 = scmp.eq.s32.totalorder %s1302_s28, 0  ;;  %s1764_s29 = smov (%p1408_p0, %s33_s29), 0 }
  0x17   : > { %1725 = sst [smem:[#allocation20_spill]] %s1764_s29  ;;  %p898_p4 = scmp.lt.s32.totalorder %s1302_s28, 4 }
  0x18   : > { %p73_p3 = por %p72_p2, %p71_p1  ;;  %s193_s6 = sand.u32 1, %s1302_s28  }
  0x19   : > { %s195_s7 = sand.u32 1, %s1282_s23   ;;  %s724_s9 = sshll.u32 %s1294_s26, 2 }
  0x1a   : > { %s723_s8 = sshll.u32 %s195_s7, 6  ;;  %s1726_s1 = sld [smem:[#allocation23_spill]] }
  0x1b   : > { %s197_s13 = scalar_lea.vmem [#allocation6], %s723_s8  ;;  %p884_p5 = pnand %p898_p4, %p73_p3 }
  0x1c   : > { %s204_s14 = sshll.u32 %s197_s13, 4  ;;  %s1430_s4 = scalar_lea.sflag [#allocation7], %s193_s6  ;;  %s205_s14 = int_to_ptr.vmem [resolvable:$true] %s204_s14 }
  0x1d   : > { %s1710_s7 = smov 128   ;;  %s1305_s25 = smov 64  }
  0x1e   : > { %s1306_s24 = smov 4   ;;  %s1435_s10 = sadd.s32 4294967295, %s1302_s28  }
  0x1f   : > { %p77_p6 = scmp.ne.s32.totalorder %s1278_s22, %s1274_s21  ;;  %p1712_p7 = scmp.eq.s32.totalorder %s1435_s10, 0 }
  0x20   : > { %s201_s12 = scalar_lea.hbm %s1726_s1, %s724_s9  ;;  %p105_p8 = scmp.ne.s32.totalorder %s1266_s19, %s1262_s18 }
  0x21   : > { %s202_s30 = sshll.u32 %s201_s12, 4  ;;  %p720_p9 = scmp.ge.s32.totalorder %s1302_s28, 1  ;;  %s203_s30 = int_to_ptr.hbm [resolvable:$true] %s202_s30 }
  0x22   : > { %886 = dma.hbm_to_vmem [thread:$0]  (!%p884_p5), %s203_s30, 1024, %s205_s14, %s1430_s4, %s1710_s7, %s1305_s25, %s1306_s24  }
  0x23   : > { %p168_p10 = scmp.lt.s32.totalorder %s1302_s28, 5  ;;  %p1446_p11 = por %p1712_p7, %p77_p6 }
  0x24   : > { %p1452_p12 = por %p105_p8, %p1712_p7  ;;  %s1730_s0 = sld [smem:[#allocation22_spill]] }
  0x25   : > { %p1456_p13 = pnand %p720_p9, %p168_p10  ;;  %s1307_s8 = smov [#allocation3]  }
  0x26   : > { %s182_s9 = sshll.u32 %s1307_s8, 4  ;;  %p99_p5 = scmp.ne.s32.totalorder %s1270_s20, %s1266_s19  ;;  %s183_s9 = int_to_ptr.vmem [resolvable:$true] %s182_s9 }
  0x27   : > { %p879_p1 = pneg %p1456_p13  ;;  %s216_s12 = sand.u32 1, %s1270_s20  }
  0x28   : > { %s1711_s13 = sshll.u32 %s1298_s27, 1  ;;  %p101_p6 = por %p99_p5, %p72_p2 }
  0x29   : > { %p880_p3 = pnand %p879_p1, %p1712_p7  ;;  %s725_s14 = sshll.u32 %s216_s12, 7 }
  0x2a   : > { %s180_s6 = sshll.u32 %s1730_s0, 4  ;;  %s841_s18 = sshll.u32 %s1294_s26, 6  ;;  %s181_s6 = int_to_ptr.hbm [resolvable:$true] %s180_s6 }
  0x2b   : > { %882 = dma.hbm_to_vmem [thread:$0]  (!%p880_p3), %s181_s6, 64, %s183_s9, [#allocation4]  }
  0x2c   : > { %s224_s30 = sadd.s32 %s841_s18, %s1711_s13  ;;  %s218_s8 = scalar_lea.vmem [#allocation8], %s725_s14 }
  0x2d   : > { %s229_s6 = sshll.u32 %s218_s8, 4  ;;  %s729_s9 = sshll.u32 %s224_s30, 2  ;;  %s230_s6 = int_to_ptr.vmem [resolvable:$true] %s229_s6 }
  0x2e   : > { %s1731_s2 = sld [smem:[#allocation24_spill]]  ;;  %p887_p8 = pnand %p898_p4, %p101_p6 }
  0x2f   : > { %s1308_s14 = smov 256   ;;  %s1309_s18 = smov 8  }
  0x30   : > { %s1732_s30 = smov 128   ;;  %s719_s8 = sadd.s32 4294967294, %s1302_s28  }
  0x31   : > { %s36_s7 = sadd.s32 1, %s1298_s27  ;;  %s61_s11 = ssub.s32 %s1294_s26, %s1764_s29 }
  0x32   : > { %s1766_s7 = smov (!%p1408_p0, %s36_s7), %s1298_s27  ;;  %p62_p9 = scmp.eq.s32.totalorder %s61_s11, 0 }
  0x33   : > { %p38_p10 = scmp.ge.s32.totalorder %s1766_s7, 2  ;;  %p125_p1 = scmp.ne.s32.totalorder %s1258_s17, %s1254_s16 }
  0x34   : > { %s226_s12 = scalar_lea.hbm %s1731_s2, %s729_s9  ;;  %s118_s9 = sadd.s32 1, %s1258_s17 }
  0x35   : > { %s227_s0 = sshll.u32 %s226_s12, 4  ;;  %s1733_s12 = sadd.s32 1, %s1282_s23  ;;  %s228_s0 = int_to_ptr.hbm [resolvable:$true] %s227_s0 }
  0x36   : > { %889 = dma.hbm_to_vmem [thread:$0]  (!%p887_p8), %s228_s0, 2048, %s230_s6, %s1430_s4, %s1308_s14, %s1732_s30, %s1309_s18  }
  0x37   : > { %s1497_s0 = scalar_select %p62_p9, %s1282_s23, %s1733_s12  }
  0x38   : > { %s1768_s7 = smov (%p38_p10, %s1766_s7), 0  ;;  %p1506_p0 = por %p125_p1, %p72_p2 }
  0x39   : > { %1734 = sst [smem:[#allocation21_spill]] %s1768_s7  ;;  %p131_p3 = scmp.ne.s32.totalorder %s1254_s16, %s1250_s15 }
  0x3a   : > { %s88_s5 = ssub.s32 %s1298_s27, %s1768_s7  ;;  %p155_p5 = scmp.eq.s32.totalorder %s1435_s10, 3 }
  0x3b   : > { %s89_s6 = sor.u32 %s88_s5, %s61_s11  ;;  %p116_p6 = scmp.eq.s32.totalorder %s88_s5, 0 }
  0x3c   : > { %p90_p8 = scmp.eq.s32.totalorder %s89_s6, 0  ;;  %p1520_p9 = por %p131_p3, %p1712_p7 }
  0x3d   : > { %s1525_s18 = scalar_select %p116_p6, %s1258_s17, %s118_s9  }
  0x3e   : > { %s1737_s30 = sadd.s32 1, %s1270_s20  ;;  %p1535_p2 = por %p155_p5, %p125_p1 }
  0x3f   : > { %s1530_s12 = scalar_select %p90_p8, %s1270_s20, %s1737_s30  }
  0x40   : > { %p161_p10 = scmp.eq.s32.totalorder %s719_s8, 3  ;;  %s239_s11 = sand.u32 1, %s1258_s17  }
  0x41   : > { %s1739_s5 = sshll.u32 %s1298_s27, 1  ;;  %s1740_s3 = sld [smem:[#allocation25_spill]] }
  0x42   : > { %p1548_p7 = por %p161_p10, %p131_p3  ;;  %s730_s9 = sshll.u32 %s239_s11, 1 }
  0x43   : > { %s243_s29 = scalar_lea.vmem [#allocation9], %s730_s9  ;;  %p890_p1 = pnand %p898_p4, %p1506_p0 }
  0x44   : > { %s251_s26 = sshll.u32 %s243_s29, 4  ;;  %s240_s8 = scalar_lea.sflag [#allocation10], %s239_s11  ;;  %s252_s26 = int_to_ptr.vmem [resolvable:$true] %s251_s26 }
  0x45   : > { %260 = sbr.rel (%p1456_p13) target bundleno = 438 (0x1b6), region = 36  ;;  %p1742_p5 = scmp.eq.s32.totalorder (!%p1456_p13), %s1435_s10, 0 }
  0x47   : > { %s247_s2 = scalar_lea.hbm %s1740_s3, %s1739_s5 }
  0x48   : > { %s249_s30 = sshll.u32 %s247_s2, 4  ;;  %s250_s30 = int_to_ptr.hbm [resolvable:$true] %s249_s30 }
  0x49   : > { %892 = dma.hbm_to_vmem [thread:$0]  (!%p890_p1), %s250_s30, 32, %s252_s26, %s240_s8  }
  0x4a   : > { %1229 = dma.done.wait (%p1742_p5), [#allocation4], 64   ;;  %p1743_p3 = pmov %p1742_p5 }
  0x4b   : > { %s267_s1 = sand.u32 1, %s1435_s10   ;;  %s269_s2 = sand.u32 1, %s1278_s22  }
  0x4c   : > { %1231 = vsyncadd (%p1743_p3), [#allocation4], 4294967232  ;;  %s734_s29 = sshll.u32 %s269_s2, 6  ;;  %s268_s4 = scalar_lea.sflag [#allocation7], %s267_s1 }
  0x4d   : > { %s1564_s5 = scalar_lea.vmem [#allocation6], %s734_s29 }
  0x4e   : > { %1233 = dma.done.wait (%p1446_p11), %s268_s4, 1024  }
  0x4f   : > { %1235 = vsyncadd (%p1446_p11), %s268_s4, 4294966272  ;;  %s279_s26 = sand.u32 1, %s1266_s19  }
  0x50   : > { %s735_s21 = sshll.u32 %s279_s26, 7 }
  0x51   : > { %s1571_s11 = scalar_lea.vmem [#allocation8], %s735_s21 }
  0x52   : > { %1237 = dma.done.wait (%p1452_p12), %s268_s4, 2048  }
  0x53   : > { %1239 = vsyncadd (%p1452_p12), %s268_s4, 4294965248  ;;  %s1578_s10 = sand.u32 1, %s1254_s16  }
  0x54   : > { %s736_s6 = sshll.u32 %s1578_s10, 1  ;;  %s288_s24 = scalar_lea.sflag [#allocation10], %s1578_s10 }
  0x55   : > { %s1582_s9 = scalar_lea.vmem [#allocation9], %s736_s6 }
  0x56   : > { %1241 = dma.done.wait (%p1520_p9), %s288_s24, 32  }
  0x57   : > { %1243 = vsyncadd (%p1520_p9), %s288_s24, 4294967264  ;;  %s737_s30 = sshll.u32 %s1578_s10, 4  ;;  %s1744_s25 = sld [smem:[#allocation17_spill]] }
  0x58   : > { %s1589_s8 = scalar_lea.vmem [#allocation11], %s737_s30 }
  0x5d   : > { %p738_p4 = scmp.ne.s32.totalorder %s1744_s25, 0 }
  0x5f   : > { %334 = sbr.rel (%p738_p4) target bundleno = 103 (0x67), region = 56 }
  0x64   : > { %v1310_v0 = vmov 0.0  }
  0x65   : > { %335 = vst [vmem:[#allocation2] sm:$0xff] %v1310_v0 }
  0x66   : > { %336 = vst [vmem:[#allocation2 + $0x8] sm:$0xff] %v1310_v0 }
  0x67 PF: > { %v849_v1 = vld [vmem:[%s1564_s5 + $0x38] sm:$0xff]  ;;  %v848_v2 = vld [vmem:[%s1564_s5 + $0x30] sm:$0xff]  ;;  %v821_v8 = vld [vmem:[%s1571_s11 + $0x60] sm:$0xf]  ;;  %s1745_s14 = sld [smem:[#allocation17_spill]] }
  0x68   : > { %402 = vmatpush.bf16.msra.mxu0 %v849_v1  ;;  %v829_v3 = vld [vmem:[%s1571_s11 + $0x70] sm:$0xf]  ;;  %v865_v4 = vld [vmem:[%s1571_s11 + $0x74] sm:$0xf0]  ;;  %v864_v5 = vld [vmem:[%s1571_s11 + $0x74] sm:$0xf] }
  0x69   : > { %v830_v6 = vor.u32 %v865_v4, %v829_v3  ;;  %v831_v7 = vld [vmem:[%s1571_s11 + $0x78] sm:$0xf0]  ;;  %v863_v9 = vld [vmem:[%s1571_s11 + $0x64] sm:$0xf0]  ;;  %v862_v11 = vld [vmem:[%s1571_s11 + $0x64] sm:$0xf] }
  0x6a   : > { %v834_v10 = vor.u32 %v864_v5, %v831_v7  ;;  %v823_v12 = vld [vmem:[%s1571_s11 + $0x68] sm:$0xf0]  ;;  %v822_v14 = vor.u32 %v863_v9, %v821_v8  ;;  %v813_v16 = vld [vmem:[%s1571_s11 + $0x50] sm:$0xf]  ;;  %v861_v17 = vld [vmem:[%s1571_s11 + $0x54] sm:$0xf0] }
  0x6b   : > { %v847_v13 = vld [vmem:[%s1564_s5 + $0x28] sm:$0xff]  ;;  %514 = vmatpush.bf16.msra.mxu1 %v830_v6  ;;  %v826_v15 = vor.u32 %v862_v11, %v823_v12  ;;  %v860_v18 = vld [vmem:[%s1571_s11 + $0x54] sm:$0xf]  ;;  %v815_v19 = vld [vmem:[%s1571_s11 + $0x58] sm:$0xf0]  ;;  %v814_v21 = vor.u32 %v861_v17, %v813_v16 }
  0x6c   : > { %403 = vmatpush.bf16.msra.mxu0 %v848_v2  ;;  %527 = vmatpush.bf16.msra.mxu2 %v834_v10  ;;  %v846_v20 = vld [vmem:[%s1564_s5 + $0x20] sm:$0xff]  ;;  %v818_v22 = vor.u32 %v860_v18, %v815_v19  ;;  %v859_v24 = vld [vmem:[%s1571_s11 + $0x44] sm:$0xf0]  ;;  %v807_v26 = vld [vmem:[%s1571_s11 + $0x48] sm:$0xf0] }
  0x6d   : > { %v805_v23 = vld [vmem:[%s1571_s11 + $0x40] sm:$0xf]  ;;  %v858_v25 = vld [vmem:[%s1571_s11 + $0x44] sm:$0xf]  ;;  %v845_v27 = vld [vmem:[%s1564_s5 + $0x18] sm:$0xff]  ;;  %p835_p11 = scmp.ne.s32.totalorder %s1745_s14, 1 }
  0x6e   : > { %v806_v28 = vor.u32 %v859_v24, %v805_v23  ;;  %v810_v29 = vor.u32 %v858_v25, %v807_v26  ;;  %v797_v30 = vld [vmem:[%s1571_s11 + $0x30] sm:$0xf]  ;;  %v857_v31 = vld [vmem:[%s1571_s11 + $0x34] sm:$0xf0]  ;;  %v856_v32 = vld [vmem:[%s1571_s11 + $0x34] sm:$0xf] }
  0x6f   : > { %515 = vmatpush.bf16.msra.mxu1 %v822_v14  ;;  %v799_v33 = vld [vmem:[%s1571_s11 + $0x38] sm:$0xf0]  ;;  %v844_v34 = vld [vmem:[%s1564_s5 + $0x10] sm:$0xff]  ;;  %v798_v35 = vor.u32 %v857_v31, %v797_v30  ;;  %v789_v37 = vld [vmem:[%s1571_s11 + $0x20] sm:$0xf] }
  0x70   : > { %404 = vmatpush.bf16.msra.mxu0 %v847_v13  ;;  %528 = vmatpush.bf16.msra.mxu2 %v826_v15  ;;  %v802_v36 = vor.u32 %v856_v32, %v799_v33  ;;  %v855_v38 = vld [vmem:[%s1571_s11 + $0x24] sm:$0xf0]  ;;  %v854_v39 = vld [vmem:[%s1571_s11 + $0x24] sm:$0xf]  ;;  %v791_v40 = vld [vmem:[%s1571_s11 + $0x28] sm:$0xf0] }
  0x71   : > { %v843_v41 = vld [vmem:[%s1564_s5 + $0x8] sm:$0xff]  ;;  %v790_v42 = vor.u32 %v855_v38, %v789_v37  ;;  %v794_v43 = vor.u32 %v854_v39, %v791_v40  ;;  %v781_v44 = vld [vmem:[%s1571_s11 + $0x10] sm:$0xf]  ;;  %v853_v45 = vld [vmem:[%s1571_s11 + $0x14] sm:$0xf0] }
  0x72   : > { %v852_v46 = vld [vmem:[%s1571_s11 + $0x14] sm:$0xf]  ;;  %v783_v47 = vld [vmem:[%s1571_s11 + $0x18] sm:$0xf0]  ;;  %v842_v48 = vld [vmem:[%s1564_s5] sm:$0xff]  ;;  %v782_v49 = vor.u32 %v853_v45, %v781_v44 }
  0x73   : > { %516 = vmatpush.bf16.msra.mxu1 %v814_v21  ;;  %v786_v50 = vor.u32 %v852_v46, %v783_v47  ;;  %v337_v51 = vld [vmem:[#allocation3] sm:$0xf]  ;;  %v773_v52 = vld [vmem:[%s1571_s11] sm:$0xf]  ;;  %v851_v53 = vld [vmem:[%s1571_s11 + $0x4] sm:$0xf0] }
  0x74   : > { %405 = vmatpush.bf16.msra.mxu0 %v846_v20  ;;  %529 = vmatpush.bf16.msra.mxu2 %v818_v22  ;;  %v850_v54 = vld [vmem:[%s1571_s11 + $0x4] sm:$0xf]  ;;  %v774_v55 = vor.u32 %v851_v53, %v773_v52  ;;  %v775_v56 = vld [vmem:[%s1571_s11 + $0x8] sm:$0xf0]  ;;  %v417_v0 = vld [vmem:[#allocation2 + $0x8] sm:$0xff] }
  0x75   : > { %v778_v57 = vor.u32 %v850_v54, %v775_v56  ;;  %v416_v61 = vld [vmem:[#allocation2] sm:$0xff] }
  0x77   : > { %517 = vmatpush.bf16.msra.mxu1 %v806_v28 }
  0x78   : > { %406 = vmatpush.bf16.msra.mxu0 %v845_v27  ;;  %530 = vmatpush.bf16.msra.mxu2 %v810_v29 }
  0x7b   : > { %518 = vmatpush.bf16.msra.mxu1 %v798_v35 }
  0x7c   : > { %407 = vmatpush.bf16.msra.mxu0 %v844_v34  ;;  %531 = vmatpush.bf16.msra.mxu2 %v802_v36 }
  0x7f   : > { %519 = vmatpush.bf16.msra.mxu1 %v790_v42 }
  0x80   : > { %408 = vmatpush.bf16.msra.mxu0 %v843_v41  ;;  %532 = vmatpush.bf16.msra.mxu2 %v794_v43 }
  0x83   : > { %520 = vmatpush.bf16.msra.mxu1 %v782_v49 }
  0x84   : > { %409 = vmatpush.bf16.msra.mxu0 %v842_v48  ;;  %533 = vmatpush.bf16.msra.mxu2 %v786_v50 }
  0x87   : > { %410 = vmatmul.bf16.vlgmr.msra.gmra.mxu0 %v337_v51  ;;  %521 = vmatpush.bf16.msra.mxu1 %v774_v55 }
  0x88   : > { %534 = vmatpush.bf16.msra.mxu2 %v778_v57 }
 0x104   : > { %v411_v58 = vpop.f32.mrf.mxu0 }
 0x105   : > { %v415_v59 = vpack.c.bf16 %v411_v58, %v411_v58 }
 0x107   : > { %522 = vmatmul.bf16.vlgmr.msra.gmra.mxu1 %v415_v59  ;;  %535 = vmatmul.bf16.vlgmr.msra.gmra.mxu2 %v415_v59 }
 0x10c   : > { %v413_v60 = vpop.f32.mrf.mxu0 }
 0x184   : > { %v523_v62 = vpop.f32.mrf.mxu1 }
 0x185   : > { %v540_v63 = vadd.f32 %v523_v62, %v416_v61 }
 0x187   : > { %542 = vst [vmem:[#allocation2] sm:$0xff] %v540_v63 }
 0x18a   : > { %v536_v1 = vpop.f32.mrf.mxu2 }
 0x18b   : > { %v541_v2 = vadd.f32 %v536_v1, %v417_v0 }
 0x18c   : > { %v525_v3 = vpop.f32.mrf.mxu1 }
 0x18d   : > { %543 = vst [vmem:[#allocation2 + $0x8] sm:$0xff] %v541_v2 }
 0x18e   : > { %547 = sbr.rel (%p835_p11) target bundleno = 417 (0x1a1), region = 60 }
 0x192   : > { %v538_v4 = vpop.f32.mrf.mxu2 }
 0x193   : > { %v548_v5 = vld [vmem:[#allocation2] sm:$0xff]  ;;  %v550_v6 = vld [vmem:[%s1582_s9] sm:$0x3] }
 0x194   : > { %v549_v7 = vld [vmem:[#allocation2 + $0x8] sm:$0xff]  ;;  %v552_v8 = vperm.slane %v550_v6, 0  ;;  %v553_v9 = vperm.slane %v550_v6, 1 }
 0x196   : > { %v556_v10 = vadd.f32 %v552_v8, %v548_v5  ;;  %v557_v11 = vadd.f32 %v553_v9, %v549_v7 }
 0x198   : > { %1020 = vtanh.f32 %v556_v10 }
 0x199   : > { %1022 = vtanh.f32 %v557_v11 }
 0x19e   : > { %v1021_v12 = vpop.eup %1020 }
 0x19f   : > { %v1023_v13 = vpop.eup %1022  ;;  %560 = vst [vmem:[%s1589_s8] sm:$0xff] %v1021_v12 }
 0x1a0   : > { %561 = vst [vmem:[%s1589_s8 + $0x8] sm:$0xff] %v1023_v13 }
 0x1a1 PF: > { %s1746_s1 = sld [smem:[#allocation18_spill]]  ;;  %s576_s21 = sshll.u32 %s1589_s8, 4  ;;  %s577_s21 = int_to_ptr.vmem [resolvable:$true] %s576_s21 }
 0x1a2   : > { %s1747_s5 = sld [smem:[#allocation26_spill]]  ;;  %s563_s6 = scalar_lea.sflag [#allocation5], %s1578_s10 }
 0x1a7   : > { %s866_s2 = sshll.u32 %s1746_s1, 4 }
 0x1a8   : > { %s574_s26 = scalar_lea.hbm %s1747_s5, %s866_s2  ;;  %s1164_s14 = scalar_lea.hbm %s1747_s5, 32 }
 0x1a9   : > { %s578_s11 = sshll.u32 %s574_s26, 4  ;;  %s579_s11 = int_to_ptr.hbm [resolvable:$true] %s578_s11 }
 0x1aa   : > { %s1158_s24 = sshra.s32 %s579_s11, 4  ;;  %s1159_s24 = int_to_ptr.hbm [resolvable:$true] %s1158_s24 }
 0x1ab   : > { %s1160_s9 = scalar_lea.hbm %s1159_s24, 16  ;;  %p1165_p6 = scmp.lt.s32.totalorder %s1159_s24, %s1747_s5 }
 0x1ac   : > { %p1161_p12 = scmp.ne.s32.totalorder %s1159_s24, %s1160_s9  ;;  %p1166_p8 = scmp.lt.s32.totalorder %s1164_s14, %s1160_s9 }
 0x1ae   : > { %p1162_p13 = pnand %p1161_p12, %p1535_p2  ;;  %p1167_p9 = por %p1166_p8, %p1165_p6 }
 0x1b0   : > { %p1163_p0 = pneg %p1162_p13 }
 0x1b2   : > { %p1168_p10 = pnand %p1167_p9, %p1163_p0 }
 0x1b4   : > { %1171 = shalt.err (!%p1168_p10)
}
 0x1b5   : > { %877 = dma.vmem_to_hbm [thread:$0]  (%p1535_p2), %s577_s21, 256, %s579_s11, %s563_s6  }
 0x1b6 PF: > { %p900_p1 = scmp.ge.s32.totalorder %s1302_s28, 2  ;;  %s590_s10 = sand.u32 1, %s1250_s15  }
 0x1b7   : > { %s591_s8 = scalar_lea.sflag [#allocation5], %s590_s10 }
 0x1b8   : > { %p894_p5 = pnand %p900_p1, %p1548_p7 }
 0x1ba   : > { %p895_p3 = pneg %p894_p5 }
 0x1bc   : > { %1245 = dma.done.wait (%p895_p3), %s591_s8, 256  }
 0x1bd   : > { %1247 = vsyncadd (%p895_p3), %s591_s8, 4294967040  ;;  %s24_s28 = sadd.s32 1, %s1302_s28   ;;  %s1749_s24 = sld [smem:[#allocation19_spill]] }
 0x1be   : > { %p1657_p4 = scmp.ge.s32.totalorder %s24_s28, 6   ;;  %s1750_s26 = sld [smem:[#allocation20_spill]] }
 0x1bf   : > { %s1751_s13 = sld [smem:[#allocation21_spill]]  ;;  %s1752_s15 = smov %s1254_s16 }
 0x1c0   : > { %s1753_s16 = smov %s1258_s17  ;;  %s1754_s17 = smov %s1525_s18 }
 0x1c1   : > { %s1755_s18 = smov %s1266_s19  ;;  %s1756_s19 = smov %s1270_s20 }
 0x1c2   : > { %s1757_s20 = smov %s1530_s12  ;;  %s1758_s21 = smov %s1278_s22 }
 0x1c3   : > { %s1759_s22 = smov %s1282_s23  ;;  %s1760_s23 = smov %s1497_s0 }
 0x1c4   : > { %s1761_s25 = smov %s1298_s27  ;;  %23 = sbr.rel (!%p1657_p4) target bundleno = 19 (0x13), region = 118 }
 0x1c5   : > { %s1762_s27 = smov %s1751_s13 }
 0x1c9   :  { %597 = vsyncpa [#allocation4], 1 }
 0x1ca   :  { %599 = vsyncpa [#allocation4 + $0x1], 1 }
 0x1cb   :  { %600 = vsyncpa [#allocation7], 1 }
 0x1cc   :  { %602 = vsyncpa [#allocation7 + $0x1], 1 }
 0x1cd   :  { %603 = vsyncpa [#allocation10], 1 }
 0x1ce   :  { %605 = vsyncpa [#allocation10 + $0x1], 1 }
 0x1cf   :  { %606 = vsyncpa [#allocation5], 1 }
 0x1d0   :  { %608 = vsyncpa [#allocation5 + $0x1], 1 }

</bundles_post_ra>
